<compile_context>
chip_gen: v6e
topology: v6e:2x2x1
jax: 0.10.0
libtpu: 0.0.40
codegen_flags: <defaults>
</compile_context>

<pallas_src>
import jax
import jax.numpy as jnp
from jax.experimental import pallas as pl
from jax.experimental.pallas import tpu as pltpu


def mlp3_kernel(x_ref, w1_ref, b1_ref, w2_ref, b2_ref, w3_ref, b3_ref, o_ref):
    # layer1: (TB, Din) @ (Din, H1) -> f32 acc, bias in f32, downcast to bf16
    h1 = jnp.dot(x_ref[...], w1_ref[...],
                 preferred_element_type=jnp.float32) + b1_ref[...]
    h1 = h1.astype(jnp.bfloat16)
    # layer2
    h2 = jnp.dot(h1, w2_ref[...],
                 preferred_element_type=jnp.float32) + b2_ref[...]
    h2 = h2.astype(jnp.bfloat16)
    # layer3
    out = jnp.dot(h2, w3_ref[...],
                  preferred_element_type=jnp.float32) + b3_ref[...]
    o_ref[...] = out.astype(o_ref.dtype)


def _round_up(n, m):
    return ((n + m - 1) // m) * m


def _pad_to(a, shape, dtype):
    pads = [(0, s - d) for d, s in zip(a.shape, shape)]
    return jnp.pad(a.astype(dtype), pads)


def nn_learn_forward(x, w1, b1, w2, b2, w3, b3, *, tile_b=512):
    """Pallas implementation of nn_learn.forward (3 stacked Linear layers).

    x:  (batch, input_dim)          float32
    wK: (in_features, out_features) float32   (transposed vs PyTorch storage)
    bK: (out_features,) or (1, out_features)  float32
    returns (batch, out_dim) float32
    """
    batch, d_in = x.shape
    h1_dim, h2_dim, d_out = w1.shape[1], w2.shape[1], w3.shape[1]

    # Lane-dense padded feature dims (multiples of 128).
    d_in_p = _round_up(d_in, 128)
    h1_p = _round_up(h1_dim, 128)
    h2_p = _round_up(h2_dim, 128)
    d_out_p = _round_up(d_out, 128)

    # Batch tiling: TILE_B multiple of 8 sublanes, batch padded to TILE_B.
    tile_b = _round_up(max(8, min(tile_b, _round_up(batch, 8))), 8)
    b_p = _round_up(batch, tile_b)
    grid = (b_p // tile_b,)

    # bf16 activations/weights (MXU-native), f32 biases (added on f32 acc).
    x_p = _pad_to(x, (b_p, d_in_p), jnp.bfloat16)
    w1_p = _pad_to(w1, (d_in_p, h1_p), jnp.bfloat16)
    w2_p = _pad_to(w2, (h1_p, h2_p), jnp.bfloat16)
    w3_p = _pad_to(w3, (h2_p, d_out_p), jnp.bfloat16)
    b1_p = _pad_to(b1.reshape(1, -1), (1, h1_p), jnp.float32)
    b2_p = _pad_to(b2.reshape(1, -1), (1, h2_p), jnp.float32)
    b3_p = _pad_to(b3.reshape(1, -1), (1, d_out_p), jnp.float32)

    # Weights/biases: constant block index -> VMEM-resident across grid steps.
    resident = lambda a: pl.BlockSpec(a.shape, lambda i: (0, 0))

    out_padded = pl.pallas_call(
        mlp3_kernel,
        out_shape=jax.ShapeDtypeStruct((b_p, d_out_p), jnp.float32),
        grid=grid,
        in_specs=[
            pl.BlockSpec((tile_b, d_in_p), lambda i: (i, 0)),
            resident(w1_p), resident(b1_p),
            resident(w2_p), resident(b2_p),
            resident(w3_p), resident(b3_p),
        ],
        out_specs=pl.BlockSpec((tile_b, d_out_p), lambda i: (i, 0)),
        compiler_params=pltpu.CompilerParams(
            dimension_semantics=("parallel",),
            vmem_limit_bytes=32 << 20,
        ),
    )(x_p, w1_p, b1_p, w2_p, b2_p, w3_p, b3_p)

    return out_padded[:batch, :d_out]


def init_linear(key, in_dim, out_dim, dtype=jnp.float32):
    """Deterministic PyTorch-style init: U(-1/sqrt(in), 1/sqrt(in))."""
    kw, kb = jax.random.split(key)
    bound = 1.0 / jnp.sqrt(in_dim)
    # Stored as (in, out) — already transposed relative to PyTorch storage.
    w = jax.random.uniform(kw, (in_dim, out_dim), dtype, -bound, bound)
    b = jax.random.uniform(kb, (1, out_dim), dtype, -bound, bound)
    return w, b


if __name__ == "__main__":
    # Shapes implied by the module: x is (batch, input_dim).
    batch, input_dim, hidden_dim1, hidden_dim2, out_dim = 256, 32, 64, 48, 16

    key = jax.random.PRNGKey(0)
    kx, k1, k2, k3 = jax.random.split(key, 4)

    x = jax.random.normal(kx, (batch, input_dim), jnp.float32)
    w1, b1 = init_linear(k1, input_dim, hidden_dim1)
    w2, b2 = init_linear(k2, hidden_dim1, hidden_dim2)
    w3, b3 = init_linear(k3, hidden_dim2, out_dim)

    # tile_b=128 -> 2 grid steps here; production batches amortize far better.
    y = nn_learn_forward(x, w1, b1, w2, b2, w3, b3, tile_b=128)
    y = jax.block_until_ready(y)

    # Reference in plain f32 JAX (same math as the PyTorch nn.Linear chain).
    # bf16 matmul inputs with f32 accumulation -> loosen tolerance accordingly.
    y_ref = ((x @ w1 + b1) @ w2 + b2) @ w3 + b3
    assert y.shape == (batch, out_dim)
    assert jnp.allclose(y, y_ref, atol=5e-2, rtol=5e-2), (
        float(jnp.max(jnp.abs(y - y_ref))))

    print("KERNEL_OK")
</pallas_src>

<mosaic_0001>
module attributes {stable_mosaic.version = 11 : i64} {
  func.func @mlp3_kernel(%arg0: i32, %arg1: memref<128x128xbf16, #tpu.memory_space<vmem>>, %arg2: memref<128x128xbf16, #tpu.memory_space<vmem>>, %arg3: memref<1x128xf32, #tpu.memory_space<vmem>>, %arg4: memref<128x128xbf16, #tpu.memory_space<vmem>>, %arg5: memref<1x128xf32, #tpu.memory_space<vmem>>, %arg6: memref<128x128xbf16, #tpu.memory_space<vmem>>, %arg7: memref<1x128xf32, #tpu.memory_space<vmem>>, %arg8: memref<128x128xf32, #tpu.memory_space<vmem>>) attributes {dimension_semantics = [#tpu.dimension_semantics<parallel>], iteration_bounds = array<i64: 2>, scalar_prefetch = 0 : i64, scratch_operands = 0 : i64, tpu.core_type = #tpu.core_type<tc>, window_params = [{transform_indices = @transform_0, window_bounds = array<i64: 128, 128>}, {pipeline_mode = #tpu.pipeline_mode<synchronous>, transform_indices = @transform_1, window_bounds = array<i64: 128, 128>}, {pipeline_mode = #tpu.pipeline_mode<synchronous>, transform_indices = @transform_2, window_bounds = array<i64: 1, 128>}, {pipeline_mode = #tpu.pipeline_mode<synchronous>, transform_indices = @transform_3, window_bounds = array<i64: 128, 128>}, {pipeline_mode = #tpu.pipeline_mode<synchronous>, transform_indices = @transform_4, window_bounds = array<i64: 1, 128>}, {pipeline_mode = #tpu.pipeline_mode<synchronous>, transform_indices = @transform_5, window_bounds = array<i64: 128, 128>}, {pipeline_mode = #tpu.pipeline_mode<synchronous>, transform_indices = @transform_6, window_bounds = array<i64: 1, 128>}, {transform_indices = @transform_7, window_bounds = array<i64: 128, 128>}]} {
    %c0 = arith.constant 0 : index
    %c0_0 = arith.constant 0 : index
    %0 = vector.load %arg1[%c0, %c0_0] : memref<128x128xbf16, #tpu.memory_space<vmem>>, vector<128x128xbf16>
    %c0_1 = arith.constant 0 : index
    %c0_2 = arith.constant 0 : index
    %1 = vector.load %arg2[%c0_1, %c0_2] : memref<128x128xbf16, #tpu.memory_space<vmem>>, vector<128x128xbf16>
    %cst = arith.constant dense<0.000000e+00> : vector<128x128xf32>
    %2 = tpu.matmul %0, %1, %cst {dimension_numbers = #tpu.dot_dimension_numbers<[1], [0], [0], [1], [0, 0, 1, 1], [], []>} : vector<128x128xbf16>, vector<128x128xbf16>, vector<128x128xf32> -> vector<128x128xf32>
    %c0_3 = arith.constant 0 : index
    %c0_4 = arith.constant 0 : index
    %3 = vector.load %arg3[%c0_3, %c0_4] : memref<1x128xf32, #tpu.memory_space<vmem>>, vector<1x128xf32>
    %4 = vector.broadcast %3 : vector<1x128xf32> to vector<128x128xf32>
    %5 = arith.addf %2, %4 : vector<128x128xf32>
    %6 = arith.truncf %5 : vector<128x128xf32> to vector<128x128xbf16>
    %c0_5 = arith.constant 0 : index
    %c0_6 = arith.constant 0 : index
    %7 = vector.load %arg4[%c0_5, %c0_6] : memref<128x128xbf16, #tpu.memory_space<vmem>>, vector<128x128xbf16>
    %cst_7 = arith.constant dense<0.000000e+00> : vector<128x128xf32>
    %8 = tpu.matmul %6, %7, %cst_7 {dimension_numbers = #tpu.dot_dimension_numbers<[1], [0], [0], [1], [0, 0, 1, 1], [], []>} : vector<128x128xbf16>, vector<128x128xbf16>, vector<128x128xf32> -> vector<128x128xf32>
    %c0_8 = arith.constant 0 : index
    %c0_9 = arith.constant 0 : index
    %9 = vector.load %arg5[%c0_8, %c0_9] : memref<1x128xf32, #tpu.memory_space<vmem>>, vector<1x128xf32>
    %10 = vector.broadcast %9 : vector<1x128xf32> to vector<128x128xf32>
    %11 = arith.addf %8, %10 : vector<128x128xf32>
    %12 = arith.truncf %11 : vector<128x128xf32> to vector<128x128xbf16>
    %c0_10 = arith.constant 0 : index
    %c0_11 = arith.constant 0 : index
    %13 = vector.load %arg6[%c0_10, %c0_11] : memref<128x128xbf16, #tpu.memory_space<vmem>>, vector<128x128xbf16>
    %cst_12 = arith.constant dense<0.000000e+00> : vector<128x128xf32>
    %14 = tpu.matmul %12, %13, %cst_12 {dimension_numbers = #tpu.dot_dimension_numbers<[1], [0], [0], [1], [0, 0, 1, 1], [], []>} : vector<128x128xbf16>, vector<128x128xbf16>, vector<128x128xf32> -> vector<128x128xf32>
    %c0_13 = arith.constant 0 : index
    %c0_14 = arith.constant 0 : index
    %15 = vector.load %arg7[%c0_13, %c0_14] : memref<1x128xf32, #tpu.memory_space<vmem>>, vector<1x128xf32>
    %16 = vector.broadcast %15 : vector<1x128xf32> to vector<128x128xf32>
    %17 = arith.addf %14, %16 : vector<128x128xf32>
    %c0_15 = arith.constant 0 : index
    %c0_16 = arith.constant 0 : index
    %18 = vector.load %arg8[%c0_15, %c0_16] : memref<128x128xf32, #tpu.memory_space<vmem>>, vector<128x128xf32>
    tpu.vector_store %arg8[%c0_15, %c0_16], %17 {strides = array<i32>} : memref<128x128xf32, #tpu.memory_space<vmem>>, vector<128x128xf32>,
    return
  }
  func.func @transform_0(%arg0: i32) -> (i32, i32) {
    %c0_i32 = arith.constant 0 : i32
    %c0_i32_0 = arith.constant 0 : i32
    return %arg0, %c0_i32 : i32, i32
  }
  func.func @transform_1(%arg0: i32) -> (i32, i32) {
    %c0_i32 = arith.constant 0 : i32
    %c0_i32_0 = arith.constant 0 : i32
    %c0_i32_1 = arith.constant 0 : i32
    return %c0_i32, %c0_i32_0 : i32, i32
  }
  func.func @transform_2(%arg0: i32) -> (i32, i32) {
    %c0_i32 = arith.constant 0 : i32
    %c0_i32_0 = arith.constant 0 : i32
    %c0_i32_1 = arith.constant 0 : i32
    return %c0_i32, %c0_i32_0 : i32, i32
  }
  func.func @transform_3(%arg0: i32) -> (i32, i32) {
    %c0_i32 = arith.constant 0 : i32
    %c0_i32_0 = arith.constant 0 : i32
    %c0_i32_1 = arith.constant 0 : i32
    return %c0_i32, %c0_i32_0 : i32, i32
  }
  func.func @transform_4(%arg0: i32) -> (i32, i32) {
    %c0_i32 = arith.constant 0 : i32
    %c0_i32_0 = arith.constant 0 : i32
    %c0_i32_1 = arith.constant 0 : i32
    return %c0_i32, %c0_i32_0 : i32, i32
  }
  func.func @transform_5(%arg0: i32) -> (i32, i32) {
    %c0_i32 = arith.constant 0 : i32
    %c0_i32_0 = arith.constant 0 : i32
    %c0_i32_1 = arith.constant 0 : i32
    return %c0_i32, %c0_i32_0 : i32, i32
  }
  func.func @transform_6(%arg0: i32) -> (i32, i32) {
    %c0_i32 = arith.constant 0 : i32
    %c0_i32_0 = arith.constant 0 : i32
    %c0_i32_1 = arith.constant 0 : i32
    return %c0_i32, %c0_i32_0 : i32, i32
  }
  func.func @transform_7(%arg0: i32) -> (i32, i32) {
    %c0_i32 = arith.constant 0 : i32
    %c0_i32_0 = arith.constant 0 : i32
    return %arg0, %c0_i32 : i32, i32
  }
}

</mosaic_0001>

<bundles_post_ra>
// kernel: tpu_custom_call.1
= control target key start
LH: loop header
LB: loop body
LE: loop exit
PB: predicated region body
PF: predicated region fallthrough
CT: control target
= control target key end

     0   :  { %s1870_s0 = inlined_call_operand.hbm [shape: bf16[256,128], index: 0, kind: input, shape index: {}]   ;;  %s1871_s1 = inlined_call_operand.hbm [shape: bf16[128,128], index: 1, kind: input, shape index: {}]   ;;  %s1872_s2 = inlined_call_operand.vmem [shape: f32[1,128], index: 2, kind: input, shape index: {}]   ;;  %s1873_s3 = inlined_call_operand.hbm [shape: bf16[128,128], index: 3, kind: input, shape index: {}]   ;;  %s1874_s4 = inlined_call_operand.vmem [shape: f32[1,128], index: 4, kind: input, shape index: {}]   ;;  %s1875_s5 = inlined_call_operand.hbm [shape: bf16[128,128], index: 5, kind: input, shape index: {}]   ;;  %s1876_s6 = inlined_call_operand.vmem [shape: f32[1,128], index: 6, kind: input, shape index: {}]   ;;  %s1877_s7 = inlined_call_operand.hbm [shape: f32[256,128], index: 7, kind: output, shape index: {}]  }
   0x1   :  { %1884 = sst [smem:[#allocation15_spill]] %s1871_s1 }
   0x2   :  { %12 = vsyncpa [#allocation3], 0 }
   0x3   :  { %14 = vsyncpa [#allocation3 + $0x1], 0 }
   0x4   :  { %15 = vsyncpa [#allocation6], 0 }
   0x5   :  { %16 = vsyncpa [#allocation9], 0 }
   0x6   :  { %17 = vsyncpa [#allocation4], 0 }
   0x7   :  { %19 = vsyncpa [#allocation4 + $0x1], 0  ;;  %s1619_s24 = smov 0   ;;  %s1621_s25 = smov 0  }
   0x8   :  { %s1623_s26 = smov 0   ;;  %s1625_s27 = smov 0  }
   0x9 LB: > { %s1640_s28 = sadd.s32 4294967295, %s1568_s27   ;;  %s1060_s29 = sadd.s32 4294967294, %s1568_s27   ;;  %s1568_s27 = sphi %s1625_s27, %s1906_s27   ;;  %s1564_s26 = sphi %s1623_s26, %s1905_s26   ;;  %s1560_s25 = sphi %s1621_s25, %s1904_s25   ;;  %s1556_s24 = sphi %s1619_s24, %s1903_s24  }
   0xa   : > { %p45_p0 = scmp.ne.s32.totalorder %s1560_s25, %s1556_s24  ;;  %p1878_p1 = scmp.eq.s32.totalorder %s1640_s28, 0 }
   0xb   : > { %p195_p2 = scmp.eq.s32.totalorder %s1640_s28, 1  ;;  %p201_p3 = scmp.eq.s32.totalorder %s1060_s29, 1 }
   0xc   : > { %p1649_p4 = por %p1878_p1, %p45_p0  ;;  %p1061_p5 = scmp.ge.s32.totalorder %s1568_s27, 1 }
   0xd   : > { %p1654_p6 = por %p201_p3, %p45_p0  ;;  %p208_p7 = scmp.lt.s32.totalorder %s1568_s27, 3 }
   0xe   : > { %s1885_s30 = scalar_select %p1649_p4, 1, 0 }
   0xf   : > { %s1886_s8 = scalar_select %p1654_p6, 1, 0 }
  0x10   : > { %p1659_p8 = pnand %p1061_p5, %p208_p7  ;;  %s1570_s10 = smov [#allocation5]  }
  0x11   : > { %s220_s11 = sshll.u32 %s1570_s10, 4  ;;  %s1571_s13 = smov [#allocation7]   ;;  %s221_s11 = int_to_ptr.vmem [resolvable:$true] %s220_s11 }
  0x12   : > { %s1887_s9 = scalar_select %p1659_p8, 1, 0 }
  0x13   : > { %p1293_p9 = pneg %p1659_p8  ;;  %s236_s14 = sshll.u32 %s1571_s13, 4  ;;  %s237_s14 = int_to_ptr.vmem [resolvable:$true] %s236_s14 }
  0x14   : > { %s1572_s15 = smov [#allocation8]   ;;  %s1401_s17 = scalar_lea.vmem %s221_s11, 1024 }
  0x15   : > { %p1668_p11 = pnand %p1293_p9, %p1878_p1  ;;  %s252_s16 = sshll.u32 %s1572_s15, 4  ;;  %s253_s16 = int_to_ptr.vmem [resolvable:$true] %s252_s16 }
  0x16   : > { %p1402_p13 = scmp.ne.s32.totalorder %s221_s11, %s1401_s17  ;;  %p1409_p5 = scmp.lt.s32.totalorder %s221_s11, %s221_s11 }
  0x17   : > { %p1392_p12 = pneg %p1668_p11  ;;  %p1410_p7 = scmp.lt.s32.totalorder %s1401_s17, %s1401_s17 }
  0x19   : > { %p1404_p0 = pnand %p1402_p13, %p1392_p12  ;;  %p1411_p9 = por %p1410_p7, %p1409_p5 }
  0x1b   : > { %p1405_p3 = pneg %p1404_p0 }
  0x1d   : > { %p1412_p10 = pnand %p1411_p9, %p1405_p3 }
  0x1f   : > { %1415 = shalt.err (!%p1412_p10)
}
  0x20   : > { %s1879_s18 = smov 64   ;;  %s1880_s19 = smov 4  }
  0x21   : > { %s1889_s1 = sld [smem:[#allocation15_spill]]  ;;  %s1427_s22 = scalar_lea.vmem %s237_s14, 1024 }
  0x22   : > { %p1428_p13 = scmp.ne.s32.totalorder %s237_s14, %s1427_s22  ;;  %p1435_p3 = scmp.lt.s32.totalorder %s237_s14, %s237_s14 }
  0x23   : > { %p1436_p10 = scmp.lt.s32.totalorder %s1427_s22, %s1427_s22 }
  0x24   : > { %p1430_p0 = pnand %p1428_p13, %p1392_p12 }
  0x25   : > { %p1437_p7 = por %p1436_p10, %p1435_p3 }
  0x26   : > { %p1431_p5 = pneg %p1430_p0 }
  0x27   : > { %1296 = dma.hbm_to_vmem [thread:$0]  (!%p1668_p11), %s1889_s1, 1024, %s221_s11, [#allocation6], %s1879_s18, %s1879_s18, %s1880_s19  }
  0x28   : > { %p1438_p9 = pnand %p1437_p7, %p1431_p5 }
  0x2a   : > { %1441 = shalt.err (!%p1438_p9)
}
  0x2b   : > { %1299 = dma.hbm_to_vmem [thread:$0]  (!%p1668_p11), %s1873_s3, 1024, %s237_s14, [#allocation6], %s1879_s18, %s1879_s18, %s1880_s19  }
  0x2c   : > { %s1453_s10 = scalar_lea.vmem %s253_s16, 1024  ;;  %p1461_p3 = scmp.lt.s32.totalorder %s253_s16, %s253_s16 }
  0x2d   : > { %p1454_p1 = scmp.ne.s32.totalorder %s253_s16, %s1453_s10  ;;  %p1462_p5 = scmp.lt.s32.totalorder %s1453_s10, %s1453_s10 }
  0x2f   : > { %p1456_p13 = pnand %p1454_p1, %p1392_p12  ;;  %p1463_p10 = por %p1462_p5, %p1461_p3 }
  0x31   : > { %p1457_p0 = pneg %p1456_p13 }
  0x33   : > { %p1464_p7 = pnand %p1463_p10, %p1457_p0 }
  0x35   : > { %1467 = shalt.err (!%p1464_p7)
}
  0x36   : > { %1302 = dma.hbm_to_vmem [thread:$0]  (!%p1668_p11), %s1875_s5, 1024, %s253_s16, [#allocation9], %s1879_s18, %s1879_s18, %s1880_s19  }
  0x37   : > { %s1708_s14 = sadd.s32 1, %s1568_s27   ;;  %s32_s15 = sadd.s32 1, %s1564_s26 }
  0x38   : > { %s29_s12 = ssub.s32 %s1568_s27, %s1708_s14  ;;  %p39_p12 = scmp.ne.s32.totalorder %s1564_s26, %s1560_s25 }
  0x39   : > { %p30_p1 = scmp.eq.s32.totalorder %s29_s12, 0  ;;  %p40_p9 = scmp.eq.s32.totalorder %s1568_s27, 0 }
  0x3a   : > { %p1314_p13 = scmp.lt.s32.totalorder %s1568_s27, 2  ;;  %p1722_p3 = por %p195_p2, %p39_p12 }
  0x3b   : > { %s1718_s17 = scalar_select %p30_p1, %s1564_s26, %s32_s15  }
  0x3c   : > { %p41_p0 = por %p40_p9, %p39_p12  ;;  %s269_s21 = sand.u32 1, %s1564_s26  }
  0x3d   : > { %s1890_s20 = scalar_select %p1722_p3, 1, 0 }
  0x3e   : > { %s1115_s22 = sshll.u32 %s1568_s27, 10  ;;  %s1066_s16 = sshll.u32 %s269_s21, 6 }
  0x3f   : > { %s1731_s10 = scalar_lea.hbm %s1870_s0, %s1115_s22  ;;  %s273_s11 = scalar_lea.vmem [#allocation2], %s1066_s16 }
  0x40   : > { %s280_s13 = sshll.u32 %s273_s11, 4  ;;  %p1733_p11 = pnand %p1314_p13, %p41_p0  ;;  %s1737_s13 = int_to_ptr.vmem [resolvable:$true] %s280_s13 }
  0x41   : > { %s1739_s15 = scalar_lea.sflag [#allocation3], %s269_s21  ;;  %s1468_s18 = scalar_lea.hbm %s1731_s10, 1024 }
  0x42   : > { %p1469_p2 = scmp.ne.s32.totalorder %s1731_s10, %s1468_s18  ;;  %p1470_p5 = pneg %p1733_p11 }
  0x43   : > { %s1473_s16 = scalar_lea.hbm %s1870_s0, 2048  ;;  %p1474_p1 = scmp.lt.s32.totalorder %s1731_s10, %s1870_s0 }
  0x44   : > { %p1471_p10 = pnand %p1470_p5, %p1469_p2  ;;  %p1475_p12 = scmp.lt.s32.totalorder %s1473_s16, %s1468_s18 }
  0x46   : > { %p1472_p7 = pneg %p1471_p10  ;;  %p1476_p9 = por %p1475_p12, %p1474_p1 }
  0x48   : > { %p1477_p13 = pnand %p1476_p9, %p1472_p7 }
  0x4a   : > { %1480 = shalt.err (!%p1477_p13)
}
  0x4b   : > { %s1481_s21 = scalar_lea.vmem %s1737_s13, 1024  ;;  %s1575_s19 = smov [#allocation2]  }
  0x4c   : > { %p1482_p0 = scmp.ne.s32.totalorder %s1737_s13, %s1481_s21  ;;  %s1486_s1 = sshll.u32 %s1575_s19, 4  ;;  %s1487_s1 = int_to_ptr.vmem [resolvable:$false] %s1486_s1 }
  0x4d   : > { %s1488_s22 = scalar_lea.vmem %s1487_s1, 2048  ;;  %p1489_p10 = scmp.lt.s32.totalorder %s1737_s13, %s1487_s1 }
  0x4e   : > { %p1484_p6 = pnand %p1482_p0, %p1470_p5  ;;  %p1490_p3 = scmp.lt.s32.totalorder %s1488_s22, %s1481_s21 }
  0x50   : > { %p1485_p2 = pneg %p1484_p6  ;;  %p1491_p4 = por %p1490_p3, %p1489_p10 }
  0x52   : > { %p1492_p8 = pnand %p1491_p4, %p1485_p2 }
  0x54   : > { %1495 = shalt.err (!%p1492_p8)
}
  0x55   : > { %s1892_s18 = smov 4   ;;  %s1893_s23 = smov 64  }
  0x56   : > { %1306 = dma.hbm_to_vmem [thread:$0]  (!%p1733_p11), %s1731_s10, 1024, %s1737_s13, %s1739_s15, %s1893_s23, %s1893_s23, %s1892_s18  }
  0x57   : > { %p1894_p6 = scmp.ne.s32.totalorder %s1887_s9, 0 }
  0x58   : > { %s1766_s19 = sand.u32 (!%p1894_p6), 1, %s1560_s25   ;;  %p1895_p4 = scmp.ne.s32.totalorder (!%p1894_p6), %s1885_s30, 0 }
  0x59   : > { %292 = sbr.rel (%p1894_p6) target bundleno = 782 (0x30e), region = 48  ;;  %s1070_s1 = sshll.u32 (!%p1894_p6), %s1766_s19, 6 }
  0x5a   : > { %s295_s16 = scalar_lea.sflag (!%p1894_p6), [#allocation3], %s1766_s19  ;;  %s1770_s29 = scalar_lea.vmem (!%p1894_p6), [#allocation2], %s1070_s1 }
  0x5e   : > { %1539 = dma.done.wait (%p1895_p4), %s295_s16, 1024  }
  0x5f   : > { %1541 = vsyncadd (%p1895_p4), %s295_s16, 4294966272  ;;  %p1896_p8 = scmp.eq.s32.totalorder %s1640_s28, 0 }
  0x61   : > { %1543 = dma.done.wait (%p1896_p8), [#allocation6], 2048   ;;  %p1897_p3 = pmov %p1896_p8 }
  0x63   : > { %1545 = vsyncadd (%p1897_p3), [#allocation6], 4294965248  ;;  %p1898_p11 = pmov %p1897_p3 }
  0x64   : > { %p1899_p5 = pmov %p1897_p3 }
  0x65   : > { %1547 = dma.done.wait (%p1898_p11), [#allocation9], 1024  }
  0x66   : > { %1549 = vsyncadd (%p1899_p5), [#allocation9], 4294966272  ;;  %v1358_v0 = vld [vmem:[#allocation5 + $0x38] sm:$0xff]   ;;  %v1359_v1 = vld [vmem:[#allocation5 + $0x30] sm:$0xff]   ;;  %s1074_s12 = sshll.u32 %s1766_s19, 7  ;;  %s1116_s22 = sshll.u32 %s1640_s28, 11 }
  0x67   : > { %1165 = vmatprep.subr.bf16.mxu0 %v1358_v0  ;;  %v1360_v2 = vld [vmem:[#allocation5 + $0x28] sm:$0xff]   ;;  %v1361_v3 = vld [vmem:[#allocation5 + $0x20] sm:$0xff]   ;;  %v1362_v5 = vld [vmem:[#allocation5 + $0x18] sm:$0xff]   ;;  %s1802_s21 = scalar_lea.vmem [#allocation10], %s1074_s12  ;;  %s1823_s16 = scalar_lea.hbm %s1877_s7, %s1116_s22 }
  0x68   : > { %1166 = vmatpush3.bf16.msra.mxu0 %v1358_v0  ;;  %v1366_v4 = vld [vmem:[%s1770_s29] sm:$0xff]   ;;  %v1363_v6 = vld [vmem:[#allocation5 + $0x10] sm:$0xff]   ;;  %v1374_v7 = vld [vmem:[#allocation7 + $0x38] sm:$0xff]   ;;  %s958_s18 = sshll.u32 %s1802_s21, 4  ;;  %p1900_p1 = scmp.ne.s32.totalorder %s1890_s20, 0  ;;  %s1825_s18 = int_to_ptr.vmem [resolvable:$true] %s958_s18 }
  0x69   : > { %1167 = vmatprep.subr.bf16.mxu0 %v1359_v1  ;;  %1181 = vmatprep.mubr.bf16.mxu0 %v1366_v4  ;;  %v1375_v8 = vld [vmem:[#allocation7 + $0x30] sm:$0xff]   ;;  %v1364_v9 = vld [vmem:[#allocation5 + $0x8] sm:$0xff]   ;;  %v1365_v11 = vld [vmem:[#allocation5] sm:$0xff]   ;;  %s1496_s28 = scalar_lea.vmem %s1825_s18, 2048  ;;  %s1576_s30 = smov [#allocation10]  }
  0x6a   : > { %1197 = vmatprep.subr.bf16.mxu1 %v1374_v7  ;;  %v1376_v10 = vld [vmem:[#allocation7 + $0x28] sm:$0xff]   ;;  %v1377_v12 = vld [vmem:[#allocation7 + $0x20] sm:$0xff]   ;;  %v1378_v13 = vld [vmem:[#allocation7 + $0x18] sm:$0xff]   ;;  %p1497_p7 = scmp.ne.s32.totalorder %s1825_s18, %s1496_s28  ;;  %s1500_s9 = sshll.u32 %s1576_s30, 4  ;;  %s1501_s9 = int_to_ptr.vmem [resolvable:$false] %s1500_s9 }
  0x6b   : > { %1198 = vmatpush3.bf16.msra.mxu1 %v1374_v7  ;;  %v1367_v14 = vld [vmem:[%s1770_s29 + $0x8] sm:$0xff]   ;;  %v1368_v15 = vld [vmem:[%s1770_s29 + $0x10] sm:$0xff]   ;;  %v1369_v16 = vld [vmem:[%s1770_s29 + $0x18] sm:$0xff]   ;;  %s1502_s10 = scalar_lea.vmem %s1501_s9, 4096  ;;  %p1503_p13 = scmp.lt.s32.totalorder %s1825_s18, %s1501_s9 }
  0x6c   : > { %1168 = vmatpush3.bf16.msra.mxu0 %v1359_v1  ;;  %1199 = vmatprep.subr.bf16.mxu1 %v1375_v8  ;;  %v1370_v17 = vld [vmem:[%s1770_s29 + $0x20] sm:$0xff]   ;;  %v1371_v18 = vld [vmem:[%s1770_s29 + $0x28] sm:$0xff]   ;;  %v1372_v19 = vld [vmem:[%s1770_s29 + $0x30] sm:$0xff]   ;;  %p1498_p12 = pnand %p1497_p7, %p1900_p1  ;;  %p1504_p0 = scmp.lt.s32.totalorder %s1502_s10, %s1496_s28 }
  0x6d   : > { %1169 = vmatprep.subr.bf16.mxu0 %v1360_v2  ;;  %v1373_v20 = vld [vmem:[%s1770_s29 + $0x38] sm:$0xff]   ;;  %v1379_v21 = vld [vmem:[#allocation7 + $0x10] sm:$0xff]   ;;  %v1380_v22 = vld [vmem:[#allocation7 + $0x8] sm:$0xff]   ;;  %s945_s29 = scalar_lea.sflag [#allocation4], %s1766_s19 }
  0x6e   : > { %v1381_v23 = vld [vmem:[#allocation7] sm:$0xff]   ;;  %v1382_v24 = vld [vmem:[#allocation8 + $0x38] sm:$0xff]   ;;  %v1383_v25 = vld [vmem:[#allocation8 + $0x30] sm:$0xff]   ;;  %p1499_p9 = pneg %p1498_p12  ;;  %p1505_p2 = por %p1504_p0, %p1503_p13 }
  0x6f   : > { %1200 = vmatpush3.bf16.msra.mxu1 %v1375_v8  ;;  %v1384_v26 = vld [vmem:[#allocation8 + $0x28] sm:$0xff]   ;;  %v1385_v27 = vld [vmem:[#allocation8 + $0x20] sm:$0xff]   ;;  %v1386_v28 = vld [vmem:[#allocation8 + $0x18] sm:$0xff]  }
  0x70   : > { %1170 = vmatpush3.bf16.msra.mxu0 %v1360_v2  ;;  %1201 = vmatprep.subr.bf16.mxu1 %v1376_v10  ;;  %v1075_v32 = vld [vmem:[%s1872_s2] ss:$0 sm:$0xff]  ;;  %v1388_v7 = vld [vmem:[#allocation8 + $0x8] sm:$0xff]   ;;  %p1506_p10 = pnand %p1505_p2, %p1499_p9 }
  0x71   : > { %1171 = vmatprep.subr.bf16.mxu0 %v1361_v3  ;;  %v1389_v8 = vld [vmem:[#allocation8] sm:$0xff]  }
  0x73   : > { %1202 = vmatpush3.bf16.msra.mxu1 %v1376_v10 }
  0x74   : > { %1172 = vmatpush3.bf16.msra.mxu0 %v1361_v3  ;;  %1203 = vmatprep.subr.bf16.mxu1 %v1377_v12 }
  0x75   : > { %1173 = vmatprep.subr.bf16.mxu0 %v1362_v5 }
  0x77   : > { %1204 = vmatpush3.bf16.msra.mxu1 %v1377_v12  ;;  %v1092_v12 = vld [vmem:[%s1874_s4] ss:$0 sm:$0xff] }
  0x78   : > { %1174 = vmatpush3.bf16.msra.mxu0 %v1362_v5  ;;  %1205 = vmatprep.subr.bf16.mxu1 %v1378_v13 }
  0x79   : > { %1175 = vmatprep.subr.bf16.mxu0 %v1363_v6 }
  0x7b   : > { %1206 = vmatpush3.bf16.msra.mxu1 %v1378_v13 }
  0x7c   : > { %1176 = vmatpush3.bf16.msra.mxu0 %v1363_v6  ;;  %1207 = vmatprep.subr.bf16.mxu1 %v1379_v21  ;;  %v1387_v6 = vld [vmem:[#allocation8 + $0x10] sm:$0xff]  }
  0x7d   : > { %1177 = vmatprep.subr.bf16.mxu0 %v1364_v9 }
  0x7f   : > { %1208 = vmatpush3.bf16.msra.mxu1 %v1379_v21 }
  0x80   : > { %1178 = vmatpush3.bf16.msra.mxu0 %v1364_v9  ;;  %1209 = vmatprep.subr.bf16.mxu1 %v1380_v22 }
  0x81   : > { %1179 = vmatprep.subr.bf16.mxu0 %v1365_v11 }
  0x83   : > { %1210 = vmatpush3.bf16.msra.mxu1 %v1380_v22 }
  0x84   : > { %1180 = vmatpush3.bf16.msra.mxu0 %v1365_v11  ;;  %1211 = vmatprep.subr.bf16.mxu1 %v1381_v23 }
  0x85   : > { %1229 = vmatprep.subr.bf16.mxu0 %v1382_v24 }
  0x87   : > { %1182 = vmatmul.mubr.bf16.vlgmr.msra.gmra.mxu0 %v1367_v14  ;;  %1212 = vmatpush3.bf16.msra.mxu1 %v1381_v23 }
  0x88   : > { %1185 = vmatprep.mubr.bf16.mxu0 %v1368_v15  ;;  %1261 = vmatprep.subr.bf16.mxu1 %v1382_v24 }
  0x89   : > { %1230 = vmatpush3.bf16.msra.mxu0 %v1382_v24 }
  0x8a   : > { %1231 = vmatprep.subr.bf16.mxu0 %v1383_v25 }
  0x8d   : > { %1232 = vmatpush3.bf16.msra.mxu0 %v1383_v25 }
  0x8e   : > { %1233 = vmatprep.subr.bf16.mxu0 %v1384_v26 }
  0x8f   : > { %1186 = vmatmul.mubr.bf16.gmra.mxu0 %v1369_v16 }
  0x90   : > { %1189 = vmatprep.mubr.bf16.mxu0 %v1370_v17 }
  0x91   : > { %1234 = vmatpush3.bf16.msra.mxu0 %v1384_v26 }
  0x92   : > { %1235 = vmatprep.subr.bf16.mxu0 %v1385_v27 }
  0x95   : > { %1236 = vmatpush3.bf16.msra.mxu0 %v1385_v27 }
  0x96   : > { %1237 = vmatprep.subr.bf16.mxu0 %v1386_v28 }
  0x97   : > { %1190 = vmatmul.mubr.bf16.gmra.mxu0 %v1371_v18 }
  0x98   : > { %1193 = vmatprep.mubr.bf16.mxu0 %v1372_v19 }
  0x99   : > { %1238 = vmatpush3.bf16.msra.mxu0 %v1386_v28 }
  0x9a   : > { %1239 = vmatprep.subr.bf16.mxu0 %v1387_v6 }
  0x9d   : > { %1240 = vmatpush3.bf16.msra.mxu0 %v1387_v6 }
  0x9e   : > { %1241 = vmatprep.subr.bf16.mxu0 %v1388_v7 }
  0x9f   : > { %1194 = vmatmul.mubr.bf16.gmra.mxu0 %v1373_v20 }
  0xa1   : > { %1242 = vmatpush3.bf16.msra.mxu0 %v1388_v7 }
  0xa2   : > { %1243 = vmatprep.subr.bf16.mxu0 %v1389_v8 }
  0xa5   : > { %1244 = vmatpush3.bf16.msra.mxu0 %v1389_v8 }
 0x147   : > { %v1183_v29 = vpop.f32.mrf.mxu0 }
 0x148   : > { %v522_v37 = vadd.f32 %v1183_v29, %v1075_v32 }
 0x149   : > { %v513_v30 = vpop.f32.mrf.mxu0 }
 0x14a   : > { %v514_v35 = vadd.f32 %v1075_v32, %v513_v30 }
 0x14b   : > { %v1184_v31 = vpop.f32.mrf.mxu0 }
 0x14c   : > { %v525_v33 = vadd.f32 %v1184_v31, %v1075_v32 }
 0x14d   : > { %v516_v34 = vpop.f32.mrf.mxu0 }
 0x14e   : > { %v517_v36 = vadd.f32 %v1075_v32, %v516_v34  ;;  %v577_v40 = vpack.c.bf16 %v525_v33, %v522_v37 }
 0x14f   : > { %v1187_v38 = vpop.f32.mrf.mxu0 }
 0x150   : > { %v576_v39 = vpack.c.bf16 %v517_v36, %v514_v35  ;;  %v538_v47 = vadd.f32 %v1187_v38, %v1075_v32 }
 0x151   : > { %v529_v41 = vpop.f32.mrf.mxu0 }
 0x152   : > { %1213 = vmatprep.mubr.bf16.mxu1 %v576_v39  ;;  %v530_v45 = vadd.f32 %v1075_v32, %v529_v41 }
 0x153   : > { %v1188_v42 = vpop.f32.mrf.mxu0  ;;  %1214 = vmatmul.mubr.bf16.vlgmr.msra.gmra.mxu1 %v577_v40 }
 0x154   : > { %1269 = vmatpush3.bf16.msra.mxu1 %v1382_v24  ;;  %v541_v43 = vadd.f32 %v1188_v42, %v1075_v32 }
 0x155   : > { %v532_v44 = vpop.f32.mrf.mxu0  ;;  %1262 = vmatprep.subr.bf16.mxu1 %v1383_v25 }
 0x156   : > { %v533_v46 = vadd.f32 %v1075_v32, %v532_v44  ;;  %v579_v50 = vpack.c.bf16 %v541_v43, %v538_v47 }
 0x157   : > { %v1191_v48 = vpop.f32.mrf.mxu0 }
 0x158   : > { %v578_v49 = vpack.c.bf16 %v533_v46, %v530_v45  ;;  %1270 = vmatpush3.bf16.msra.mxu1 %v1383_v25  ;;  %v554_v57 = vadd.f32 %v1191_v48, %v1075_v32 }
 0x159   : > { %v545_v51 = vpop.f32.mrf.mxu0  ;;  %1263 = vmatprep.subr.bf16.mxu1 %v1384_v26 }
 0x15a   : > { %1217 = vmatprep.mubr.bf16.mxu1 %v578_v49  ;;  %v546_v55 = vadd.f32 %v1075_v32, %v545_v51 }
 0x15b   : > { %v1192_v52 = vpop.f32.mrf.mxu0  ;;  %1218 = vmatmul.mubr.bf16.gmra.mxu1 %v579_v50  ;;  %v1101_v50 = vld [vmem:[%s1876_s6] ss:$0 sm:$0xff] }
 0x15c   : > { %1271 = vmatpush3.bf16.msra.mxu1 %v1384_v26  ;;  %v557_v53 = vadd.f32 %v1192_v52, %v1075_v32 }
 0x15d   : > { %v548_v54 = vpop.f32.mrf.mxu0  ;;  %1264 = vmatprep.subr.bf16.mxu1 %v1385_v27 }
 0x15e   : > { %v549_v56 = vadd.f32 %v1075_v32, %v548_v54  ;;  %v581_v60 = vpack.c.bf16 %v557_v53, %v554_v57 }
 0x15f   : > { %v1195_v58 = vpop.f32.mrf.mxu0 }
 0x160   : > { %v580_v59 = vpack.c.bf16 %v549_v56, %v546_v55  ;;  %1272 = vmatpush3.bf16.msra.mxu1 %v1385_v27  ;;  %v570_v3 = vadd.f32 %v1195_v58, %v1075_v32 }
 0x161   : > { %v561_v61 = vpop.f32.mrf.mxu0  ;;  %1265 = vmatprep.subr.bf16.mxu1 %v1386_v28 }
 0x162   : > { %1221 = vmatprep.mubr.bf16.mxu1 %v580_v59  ;;  %v562_v1 = vadd.f32 %v1075_v32, %v561_v61 }
 0x163   : > { %v1196_v62 = vpop.f32.mrf.mxu0  ;;  %1222 = vmatmul.mubr.bf16.gmra.mxu1 %v581_v60 }
 0x164   : > { %1273 = vmatpush3.bf16.msra.mxu1 %v1386_v28  ;;  %v573_v63 = vadd.f32 %v1196_v62, %v1075_v32 }
 0x165   : > { %v564_v0 = vpop.f32.mrf.mxu0  ;;  %1266 = vmatprep.subr.bf16.mxu1 %v1387_v6 }
 0x166   : > { %v565_v2 = vadd.f32 %v1075_v32, %v564_v0  ;;  %v583_v5 = vpack.c.bf16 %v573_v63, %v570_v3 }
 0x168   : > { %v582_v4 = vpack.c.bf16 %v565_v2, %v562_v1  ;;  %1274 = vmatpush3.bf16.msra.mxu1 %v1387_v6 }
 0x169   : > { %1267 = vmatprep.subr.bf16.mxu1 %v1388_v7 }
 0x16a   : > { %1225 = vmatprep.mubr.bf16.mxu1 %v582_v4 }
 0x16b   : > { %1226 = vmatmul.mubr.bf16.gmra.mxu1 %v583_v5 }
 0x16c   : > { %1275 = vmatpush3.bf16.msra.mxu1 %v1388_v7 }
 0x16d   : > { %1268 = vmatprep.subr.bf16.mxu1 %v1389_v8 }
 0x170   : > { %1276 = vmatpush3.bf16.msra.mxu1 %v1389_v8 }
 0x213   : > { %v1215_v9 = vpop.f32.mrf.mxu1 }
 0x214   : > { %v698_v17 = vadd.f32 %v1215_v9, %v1092_v12 }
 0x215   : > { %v689_v10 = vpop.f32.mrf.mxu1 }
 0x216   : > { %v690_v15 = vadd.f32 %v1092_v12, %v689_v10 }
 0x217   : > { %v1216_v11 = vpop.f32.mrf.mxu1 }
 0x218   : > { %v701_v13 = vadd.f32 %v1216_v11, %v1092_v12 }
 0x219   : > { %v692_v14 = vpop.f32.mrf.mxu1 }
 0x21a   : > { %v693_v16 = vadd.f32 %v1092_v12, %v692_v14  ;;  %v753_v20 = vpack.c.bf16 %v701_v13, %v698_v17 }
 0x21b   : > { %v1219_v18 = vpop.f32.mrf.mxu1 }
 0x21c   : > { %v752_v19 = vpack.c.bf16 %v693_v16, %v690_v15  ;;  %v714_v27 = vadd.f32 %v1219_v18, %v1092_v12 }
 0x21d   : > { %v705_v21 = vpop.f32.mrf.mxu1 }
 0x21e   : > { %1245 = vmatprep.mubr.bf16.mxu0 %v752_v19  ;;  %v706_v25 = vadd.f32 %v1092_v12, %v705_v21 }
 0x21f   : > { %v1220_v22 = vpop.f32.mrf.mxu1  ;;  %1246 = vmatmul.mubr.bf16.vlgmr.msra.gmra.mxu0 %v753_v20 }
 0x220   : > { %v717_v23 = vadd.f32 %v1220_v22, %v1092_v12 }
 0x221   : > { %v708_v24 = vpop.f32.mrf.mxu1 }
 0x222   : > { %v709_v26 = vadd.f32 %v1092_v12, %v708_v24  ;;  %v755_v30 = vpack.c.bf16 %v717_v23, %v714_v27 }
 0x223   : > { %v1223_v28 = vpop.f32.mrf.mxu1 }
 0x224   : > { %v754_v29 = vpack.c.bf16 %v709_v26, %v706_v25  ;;  %v730_v37 = vadd.f32 %v1223_v28, %v1092_v12 }
 0x225   : > { %v721_v31 = vpop.f32.mrf.mxu1 }
 0x226   : > { %1249 = vmatprep.mubr.bf16.mxu0 %v754_v29  ;;  %v722_v35 = vadd.f32 %v1092_v12, %v721_v31 }
 0x227   : > { %v1224_v32 = vpop.f32.mrf.mxu1  ;;  %1250 = vmatmul.mubr.bf16.gmra.mxu0 %v755_v30 }
 0x228   : > { %v733_v33 = vadd.f32 %v1224_v32, %v1092_v12 }
 0x229   : > { %v724_v34 = vpop.f32.mrf.mxu1 }
 0x22a   : > { %v725_v36 = vadd.f32 %v1092_v12, %v724_v34  ;;  %v757_v40 = vpack.c.bf16 %v733_v33, %v730_v37 }
 0x22b   : > { %v1227_v38 = vpop.f32.mrf.mxu1 }
 0x22c   : > { %v756_v39 = vpack.c.bf16 %v725_v36, %v722_v35  ;;  %v746_v47 = vadd.f32 %v1227_v38, %v1092_v12 }
 0x22d   : > { %v737_v41 = vpop.f32.mrf.mxu1 }
 0x22e   : > { %1253 = vmatprep.mubr.bf16.mxu1 %v756_v39  ;;  %v738_v45 = vadd.f32 %v1092_v12, %v737_v41 }
 0x22f   : > { %v1228_v42 = vpop.f32.mrf.mxu1  ;;  %1254 = vmatmul.mubr.bf16.vlgmr.msra.gmra.mxu1 %v757_v40 }
 0x230   : > { %v749_v43 = vadd.f32 %v1228_v42, %v1092_v12 }
 0x231   : > { %v740_v44 = vpop.f32.mrf.mxu1 }
 0x232   : > { %v741_v46 = vadd.f32 %v1092_v12, %v740_v44  ;;  %v759_v49 = vpack.c.bf16 %v749_v43, %v746_v47 }
 0x234   : > { %v758_v48 = vpack.c.bf16 %v741_v46, %v738_v45 }
 0x236   : > { %1257 = vmatprep.mubr.bf16.mxu1 %v758_v48 }
 0x237   : > { %1258 = vmatmul.mubr.bf16.gmra.mxu1 %v759_v49 }
 0x2df   : > { %v1247_v51 = vpop.f32.mrf.mxu0 }
 0x2e0   : > { %v874_v52 = vadd.f32 %v1247_v51, %v1101_v50 }
 0x2e1   : > { %v865_v53 = vpop.f32.mrf.mxu0 }
 0x2e2   : > { %930 = vst [vmem:[%s1802_s21 + $0x10] sm:$0xff] %v874_v52  ;;  %v866_v54 = vadd.f32 %v1101_v50, %v865_v53 }
 0x2e3   : > { %v1248_v55 = vpop.f32.mrf.mxu0 }
 0x2e4   : > { %928 = vst [vmem:[%s1802_s21] sm:$0xff] %v866_v54  ;;  %v877_v56 = vadd.f32 %v1248_v55, %v1101_v50 }
 0x2e5   : > { %v868_v57 = vpop.f32.mrf.mxu0 }
 0x2e6   : > { %931 = vst [vmem:[%s1802_s21 + $0x18] sm:$0xff] %v877_v56  ;;  %v869_v58 = vadd.f32 %v1101_v50, %v868_v57 }
 0x2e7   : > { %v1251_v59 = vpop.f32.mrf.mxu0 }
 0x2e8   : > { %929 = vst [vmem:[%s1802_s21 + $0x8] sm:$0xff] %v869_v58  ;;  %v890_v60 = vadd.f32 %v1251_v59, %v1101_v50 }
 0x2e9   : > { %v881_v61 = vpop.f32.mrf.mxu0 }
 0x2ea   : > { %934 = vst [vmem:[%s1802_s21 + $0x30] sm:$0xff] %v890_v60  ;;  %v882_v62 = vadd.f32 %v1101_v50, %v881_v61 }
 0x2eb   : > { %v1252_v63 = vpop.f32.mrf.mxu0 }
 0x2ec   : > { %932 = vst [vmem:[%s1802_s21 + $0x20] sm:$0xff] %v882_v62  ;;  %v893_v0 = vadd.f32 %v1252_v63, %v1101_v50 }
 0x2ed   : > { %v884_v1 = vpop.f32.mrf.mxu0 }
 0x2ee   : > { %935 = vst [vmem:[%s1802_s21 + $0x38] sm:$0xff] %v893_v0  ;;  %v885_v2 = vadd.f32 %v1101_v50, %v884_v1 }
 0x2ef   : > { %v1255_v3 = vpop.f32.mrf.mxu1 }
 0x2f0   : > { %933 = vst [vmem:[%s1802_s21 + $0x28] sm:$0xff] %v885_v2  ;;  %v906_v4 = vadd.f32 %v1255_v3, %v1101_v50 }
 0x2f1   : > { %v897_v5 = vpop.f32.mrf.mxu1 }
 0x2f2   : > { %938 = vst [vmem:[%s1802_s21 + $0x50] sm:$0xff] %v906_v4  ;;  %v898_v6 = vadd.f32 %v1101_v50, %v897_v5 }
 0x2f3   : > { %v1256_v7 = vpop.f32.mrf.mxu1 }
 0x2f4   : > { %936 = vst [vmem:[%s1802_s21 + $0x40] sm:$0xff] %v898_v6  ;;  %v909_v8 = vadd.f32 %v1256_v7, %v1101_v50 }
 0x2f5   : > { %v900_v9 = vpop.f32.mrf.mxu1 }
 0x2f6   : > { %939 = vst [vmem:[%s1802_s21 + $0x58] sm:$0xff] %v909_v8  ;;  %v901_v10 = vadd.f32 %v1101_v50, %v900_v9 }
 0x2f7   : > { %v1259_v11 = vpop.f32.mrf.mxu1 }
 0x2f8   : > { %937 = vst [vmem:[%s1802_s21 + $0x48] sm:$0xff] %v901_v10  ;;  %v922_v12 = vadd.f32 %v1259_v11, %v1101_v50 }
 0x2f9   : > { %v913_v13 = vpop.f32.mrf.mxu1 }
 0x2fa   : > { %942 = vst [vmem:[%s1802_s21 + $0x70] sm:$0xff] %v922_v12  ;;  %v914_v14 = vadd.f32 %v1101_v50, %v913_v13 }
 0x2fb   : > { %v1260_v15 = vpop.f32.mrf.mxu1 }
 0x2fc   : > { %940 = vst [vmem:[%s1802_s21 + $0x60] sm:$0xff] %v914_v14  ;;  %v925_v16 = vadd.f32 %v1260_v15, %v1101_v50 }
 0x2fd   : > { %v916_v17 = vpop.f32.mrf.mxu1 }
 0x2fe   : > { %943 = vst [vmem:[%s1802_s21 + $0x78] sm:$0xff] %v925_v16  ;;  %v917_v18 = vadd.f32 %v1101_v50, %v916_v17 }
 0x300   : > { %941 = vst [vmem:[%s1802_s21 + $0x68] sm:$0xff] %v917_v18 }
 0x301   : > { %1509 = shalt.err (!%p1506_p10)
}
 0x302   : > { %s1510_s13 = scalar_lea.hbm %s1823_s16, 2048  ;;  %s1514_s11 = scalar_lea.hbm %s1877_s7, 4096 }
 0x303   : > { %p1511_p6 = scmp.ne.s32.totalorder %s1823_s16, %s1510_s13  ;;  %p1515_p3 = scmp.lt.s32.totalorder %s1823_s16, %s1877_s7 }
 0x304   : > { %p1516_p11 = scmp.lt.s32.totalorder %s1514_s11, %s1510_s13 }
 0x305   : > { %p1512_p4 = pnand %p1511_p6, %p1900_p1 }
 0x306   : > { %p1517_p5 = por %p1516_p11, %p1515_p3 }
 0x307   : > { %p1513_p8 = pneg %p1512_p4 }
 0x309   : > { %p1518_p7 = pnand %p1517_p5, %p1513_p8 }
 0x30b   : > { %1521 = shalt.err (!%p1518_p7)
}
 0x30c   : > { %s1577_s23 = smov 128   ;;  %s1578_s1 = smov 8  }
 0x30d   : > { %1291 = dma.vmem_to_hbm [thread:$0]  (%p1900_p1), %s1825_s18, 2048, %s1823_s16, %s945_s29, %s1577_s23, %s1577_s23, %s1578_s1  }
 0x30e PF: > { %s973_s28 = sand.u32 1, %s1556_s24   ;;  %p1901_p12 = scmp.ne.s32.totalorder %s1886_s8, 0 }
 0x30f   : > { %p1902_p9 = scmp.ge.s32.totalorder %s1568_s27, 2  ;;  %s974_s30 = scalar_lea.sflag [#allocation4], %s973_s28 }
 0x311   : > { %p1308_p13 = pnand %p1902_p9, %p1901_p12 }
 0x313   : > { %p1309_p0 = pneg %p1308_p13 }
 0x315   : > { %1551 = dma.done.wait (%p1309_p0), %s974_s30, 2048  }
 0x316   : > { %1553 = vsyncadd (%p1309_p0), %s974_s30, 4294965248  ;;  %p22_p2 = scmp.ge.s32.totalorder %s1708_s14, 4   ;;  %s1903_s24 = smov %s1560_s25 }
 0x317   : > { %s1904_s25 = smov %s1564_s26  ;;  %s1905_s26 = smov %s1718_s17 }
 0x318   : > { %s1906_s27 = smov %s1708_s14  ;;  %24 = sbr.rel (!%p22_p2) target bundleno = 9 (0x9), region = 105 }
 0x31d   :  { %979 = vsyncpa [#allocation3], 1 }
 0x31e   :  { %981 = vsyncpa [#allocation3 + $0x1], 1 }
 0x31f   :  { %982 = vsyncpa [#allocation6], 1 }
 0x320   :  { %983 = vsyncpa [#allocation9], 1 }
 0x321   :  { %984 = vsyncpa [#allocation4], 1 }
 0x322   :  { %986 = vsyncpa [#allocation4 + $0x1], 1 }

</bundles_post_ra>
